<compile_context>
chip_gen: v6e
topology: v6e:2x2x1
jax: 0.10.0
libtpu: 0.0.40
codegen_flags: <defaults>
</compile_context>

<pallas_src>
import functools

import jax
import jax.numpy as jnp
from jax.experimental import pallas as pl
from jax.experimental.pallas import tpu as pltpu


def _round_up(x, m):
    return (x + m - 1) // m * m


def _ffn_body(x_ref, w1_ref, b1_ref, w2_ref, b2_ref, compute_dtype):
    # mlp1 + bias + ReLU   (bf16 MXU inputs, f32 accumulation)
    h = jnp.dot(x_ref[...].astype(compute_dtype), w1_ref[...],
                preferred_element_type=jnp.float32)
    h = jnp.maximum(h + b1_ref[...], 0.0)
    # mlp2 + bias
    y = jnp.dot(h.astype(compute_dtype), w2_ref[...],
                preferred_element_type=jnp.float32)
    return y + b2_ref[...]


def _ffn_kernel(x_ref, w1_ref, b1_ref, w2_ref, b2_ref, o_ref, *, compute_dtype):
    y = _ffn_body(x_ref, w1_ref, b1_ref, w2_ref, b2_ref, compute_dtype)
    o_ref[...] = y.astype(o_ref.dtype)


def _ffn_dropout_kernel(x_ref, w1_ref, b1_ref, w2_ref, b2_ref, bits_ref, o_ref,
                        *, compute_dtype, keep_threshold, scale):
    y = _ffn_body(x_ref, w1_ref, b1_ref, w2_ref, b2_ref, compute_dtype)
    # Inverted dropout: drop with prob p  <=>  keep iff bits >= p * 2^32.
    keep = bits_ref[...] >= jnp.uint32(keep_threshold)
    y = jnp.where(keep, y * jnp.float32(scale), jnp.float32(0.0))
    o_ref[...] = y.astype(o_ref.dtype)


def feed_forward(x, w1, b1, w2, b2, *, p_dropout=0.0, training=False,
                 seed=0, tm=512, compute_dtype=jnp.bfloat16):
    """Pallas FeedForward: mlp2(relu(mlp1(x))) with (inverted) dropout.

    x : (..., d_e) float32
    w1: (d_e, hidden)   b1: (hidden,)
    w2: (hidden, d_e)   b2: (d_e,)
    """
    batch_shape = x.shape[:-1]
    d_e = x.shape[-1]
    hidden = w1.shape[1]

    xf = x.reshape(-1, d_e)
    n = xf.shape[0]

    # Lane-dense feature dims (multiples of 128); zero padding is exact.
    d_pad = _round_up(d_e, 128)
    h_pad = _round_up(hidden, 128)

    # Row tile: as large as possible (MXU / pipeline-overhead amortization),
    # but never larger than the (8-aligned) token count.  Pad N instead of
    # asserting divisibility.
    tm = min(tm, _round_up(n, 8))
    n_pad = _round_up(n, tm)

    # Zero-padded operands; weights pre-cast to the MXU compute dtype.
    xf_p = jnp.zeros((n_pad, d_pad), x.dtype).at[:n, :d_e].set(xf)
    w1_p = jnp.zeros((d_pad, h_pad), compute_dtype).at[:d_e, :hidden].set(
        w1.astype(compute_dtype))
    w2_p = jnp.zeros((h_pad, d_pad), compute_dtype).at[:hidden, :d_e].set(
        w2.astype(compute_dtype))
    b1_p = jnp.zeros((1, h_pad), jnp.float32).at[0, :hidden].set(
        b1.astype(jnp.float32))
    b2_p = jnp.zeros((1, d_pad), jnp.float32).at[0, :d_e].set(
        b2.astype(jnp.float32))

    grid = (n_pad // tm,)
    x_spec = pl.BlockSpec((tm, d_pad), lambda i: (i, 0))
    w1_spec = pl.BlockSpec((d_pad, h_pad), lambda i: (0, 0))
    b1_spec = pl.BlockSpec((1, h_pad), lambda i: (0, 0))
    w2_spec = pl.BlockSpec((h_pad, d_pad), lambda i: (0, 0))
    b2_spec = pl.BlockSpec((1, d_pad), lambda i: (0, 0))
    out_spec = pl.BlockSpec((tm, d_pad), lambda i: (i, 0))

    itemsize = jnp.dtype(compute_dtype).itemsize
    cost = pl.CostEstimate(
        flops=2 * 2 * n_pad * d_pad * h_pad,
        transcendentals=0,
        bytes_accessed=(n_pad * d_pad * 4                 # x
                        + d_pad * h_pad * itemsize        # w1
                        + h_pad * d_pad * itemsize        # w2
                        + (h_pad + d_pad) * 4             # biases
                        + n_pad * d_pad * 4))             # out

    cparams = pltpu.CompilerParams(
        dimension_semantics=("parallel",),
        vmem_limit_bytes=48 * 1024 * 1024)

    use_dropout = bool(training) and float(p_dropout) > 0.0
    if use_dropout:
        p = float(p_dropout)
        keep_threshold = min(int(p * (2 ** 32)), 2 ** 32 - 1)
        scale = 1.0 / (1.0 - p)
        bits = jax.random.bits(jax.random.PRNGKey(seed), (n_pad, d_pad),
                               dtype=jnp.uint32)
        bits_spec = pl.BlockSpec((tm, d_pad), lambda i: (i, 0))
        kernel = functools.partial(_ffn_dropout_kernel,
                                   compute_dtype=compute_dtype,
                                   keep_threshold=keep_threshold,
                                   scale=scale)
        out = pl.pallas_call(
            kernel,
            out_shape=jax.ShapeDtypeStruct((n_pad, d_pad), x.dtype),
            grid=grid,
            in_specs=[x_spec, w1_spec, b1_spec, w2_spec, b2_spec, bits_spec],
            out_specs=out_spec,
            compiler_params=cparams,
            cost_estimate=cost,
        )(xf_p, w1_p, b1_p, w2_p, b2_p, bits)
    else:
        kernel = functools.partial(_ffn_kernel, compute_dtype=compute_dtype)
        out = pl.pallas_call(
            kernel,
            out_shape=jax.ShapeDtypeStruct((n_pad, d_pad), x.dtype),
            grid=grid,
            in_specs=[x_spec, w1_spec, b1_spec, w2_spec, b2_spec],
            out_specs=out_spec,
            compiler_params=cparams,
            cost_estimate=cost,
        )(xf_p, w1_p, b1_p, w2_p, b2_p)

    return out[:n, :d_e].reshape(*batch_shape, d_e)


def init_params(key, d_e, hidden_layer_width):
    """Deterministic torch.nn.Linear-style init (uniform(-1/sqrt(fan_in), +))."""
    k1, k2, k3, k4 = jax.random.split(key, 4)
    lim1 = 1.0 / jnp.sqrt(d_e)
    lim2 = 1.0 / jnp.sqrt(hidden_layer_width)
    # stored pre-transposed: (in, out) so that y = x @ W + b
    w1 = jax.random.uniform(k1, (d_e, hidden_layer_width), jnp.float32,
                            -lim1, lim1)
    b1 = jax.random.uniform(k2, (hidden_layer_width,), jnp.float32,
                            -lim1, lim1)
    w2 = jax.random.uniform(k3, (hidden_layer_width, d_e), jnp.float32,
                            -lim2, lim2)
    b2 = jax.random.uniform(k4, (d_e,), jnp.float32, -lim2, lim2)
    return w1, b1, w2, b2


if __name__ == "__main__":
    # Small shapes implied by the module: token activations of width d_e.
    batch, seq, d_e, hidden = 2, 8, 32, 64
    p_dropout = 0.1

    key = jax.random.PRNGKey(0)
    kx, kp = jax.random.split(key)
    x = jax.random.normal(kx, (batch, seq, d_e), dtype=jnp.float32)
    w1, b1, w2, b2 = init_params(kp, d_e, hidden)

    # Eval-mode forward (dropout = identity), checked against a pure-JAX
    # reference that uses the same bf16-inputs / f32-accumulation MXU path.
    y_eval = feed_forward(x, w1, b1, w2, b2, p_dropout=p_dropout,
                          training=False)
    jax.block_until_ready(y_eval)

    xb = x.reshape(-1, d_e).astype(jnp.bfloat16)
    h_ref = jnp.maximum(
        jnp.dot(xb, w1.astype(jnp.bfloat16),
                preferred_element_type=jnp.float32) + b1, 0.0)
    ref = jnp.dot(h_ref.astype(jnp.bfloat16), w2.astype(jnp.bfloat16),
                  preferred_element_type=jnp.float32) + b2
    ref = ref.reshape(batch, seq, d_e)
    assert jnp.allclose(y_eval, ref, atol=2e-2, rtol=2e-2), "mismatch vs ref"

    # Training-mode forward (dropout active, mask from jax.random bits).
    y_train = feed_forward(x, w1, b1, w2, b2, p_dropout=p_dropout,
                           training=True, seed=123)
    jax.block_until_ready(y_train)
    assert y_train.shape == x.shape

    print("KERNEL_OK")
</pallas_src>

<mosaic_0001>
module attributes {stable_mosaic.version = 11 : i64} {
  func.func @_ffn_kernel(%arg0: i32, %arg1: memref<16x128xf32, #tpu.memory_space<vmem>>, %arg2: memref<128x128xbf16, #tpu.memory_space<vmem>>, %arg3: memref<1x128xf32, #tpu.memory_space<vmem>>, %arg4: memref<128x128xbf16, #tpu.memory_space<vmem>>, %arg5: memref<1x128xf32, #tpu.memory_space<vmem>>, %arg6: memref<16x128xf32, #tpu.memory_space<vmem>>) attributes {dimension_semantics = [#tpu.dimension_semantics<parallel>], iteration_bounds = array<i64: 1>, scalar_prefetch = 0 : i64, scratch_operands = 0 : i64, tpu.core_type = #tpu.core_type<tc>, window_params = [{transform_indices = @transform_0, window_bounds = array<i64: 16, 128>}, {pipeline_mode = #tpu.pipeline_mode<synchronous>, transform_indices = @transform_1, window_bounds = array<i64: 128, 128>}, {pipeline_mode = #tpu.pipeline_mode<synchronous>, transform_indices = @transform_2, window_bounds = array<i64: 1, 128>}, {pipeline_mode = #tpu.pipeline_mode<synchronous>, transform_indices = @transform_3, window_bounds = array<i64: 128, 128>}, {pipeline_mode = #tpu.pipeline_mode<synchronous>, transform_indices = @transform_4, window_bounds = array<i64: 1, 128>}, {transform_indices = @transform_5, window_bounds = array<i64: 16, 128>}]} {
    %c0 = arith.constant 0 : index
    %c0_0 = arith.constant 0 : index
    %0 = vector.load %arg1[%c0, %c0_0] : memref<16x128xf32, #tpu.memory_space<vmem>>, vector<16x128xf32>
    %1 = arith.truncf %0 : vector<16x128xf32> to vector<16x128xbf16>
    %c0_1 = arith.constant 0 : index
    %c0_2 = arith.constant 0 : index
    %2 = vector.load %arg2[%c0_1, %c0_2] : memref<128x128xbf16, #tpu.memory_space<vmem>>, vector<128x128xbf16>
    %cst = arith.constant dense<0.000000e+00> : vector<16x128xf32>
    %3 = tpu.matmul %1, %2, %cst {dimension_numbers = #tpu.dot_dimension_numbers<[1], [0], [0], [1], [0, 0, 1, 1], [], []>} : vector<16x128xbf16>, vector<128x128xbf16>, vector<16x128xf32> -> vector<16x128xf32>
    %c0_3 = arith.constant 0 : index
    %c0_4 = arith.constant 0 : index
    %4 = vector.load %arg3[%c0_3, %c0_4] : memref<1x128xf32, #tpu.memory_space<vmem>>, vector<1x128xf32>
    %5 = vector.broadcast %4 : vector<1x128xf32> to vector<16x128xf32>
    %6 = arith.addf %3, %5 : vector<16x128xf32>
    %cst_5 = arith.constant 0.000000e+00 : f32
    %7 = vector.broadcast %cst_5 : f32 to vector<16x128xf32>
    %8 = arith.maximumf %6, %7 : vector<16x128xf32>
    %9 = arith.truncf %8 : vector<16x128xf32> to vector<16x128xbf16>
    %c0_6 = arith.constant 0 : index
    %c0_7 = arith.constant 0 : index
    %10 = vector.load %arg4[%c0_6, %c0_7] : memref<128x128xbf16, #tpu.memory_space<vmem>>, vector<128x128xbf16>
    %cst_8 = arith.constant dense<0.000000e+00> : vector<16x128xf32>
    %11 = tpu.matmul %9, %10, %cst_8 {dimension_numbers = #tpu.dot_dimension_numbers<[1], [0], [0], [1], [0, 0, 1, 1], [], []>} : vector<16x128xbf16>, vector<128x128xbf16>, vector<16x128xf32> -> vector<16x128xf32>
    %c0_9 = arith.constant 0 : index
    %c0_10 = arith.constant 0 : index
    %12 = vector.load %arg5[%c0_9, %c0_10] : memref<1x128xf32, #tpu.memory_space<vmem>>, vector<1x128xf32>
    %13 = vector.broadcast %12 : vector<1x128xf32> to vector<16x128xf32>
    %14 = arith.addf %11, %13 : vector<16x128xf32>
    %c0_11 = arith.constant 0 : index
    %c0_12 = arith.constant 0 : index
    %15 = vector.load %arg6[%c0_11, %c0_12] : memref<16x128xf32, #tpu.memory_space<vmem>>, vector<16x128xf32>
    tpu.vector_store %arg6[%c0_11, %c0_12], %14 {strides = array<i32>} : memref<16x128xf32, #tpu.memory_space<vmem>>, vector<16x128xf32>,
    return
  }
  func.func @transform_0(%arg0: i32) -> (i32, i32) {
    %c0_i32 = arith.constant 0 : i32
    %c0_i32_0 = arith.constant 0 : i32
    return %arg0, %c0_i32 : i32, i32
  }
  func.func @transform_1(%arg0: i32) -> (i32, i32) {
    %c0_i32 = arith.constant 0 : i32
    %c0_i32_0 = arith.constant 0 : i32
    %c0_i32_1 = arith.constant 0 : i32
    return %c0_i32, %c0_i32_0 : i32, i32
  }
  func.func @transform_2(%arg0: i32) -> (i32, i32) {
    %c0_i32 = arith.constant 0 : i32
    %c0_i32_0 = arith.constant 0 : i32
    %c0_i32_1 = arith.constant 0 : i32
    return %c0_i32, %c0_i32_0 : i32, i32
  }
  func.func @transform_3(%arg0: i32) -> (i32, i32) {
    %c0_i32 = arith.constant 0 : i32
    %c0_i32_0 = arith.constant 0 : i32
    %c0_i32_1 = arith.constant 0 : i32
    return %c0_i32, %c0_i32_0 : i32, i32
  }
  func.func @transform_4(%arg0: i32) -> (i32, i32) {
    %c0_i32 = arith.constant 0 : i32
    %c0_i32_0 = arith.constant 0 : i32
    %c0_i32_1 = arith.constant 0 : i32
    return %c0_i32, %c0_i32_0 : i32, i32
  }
  func.func @transform_5(%arg0: i32) -> (i32, i32) {
    %c0_i32 = arith.constant 0 : i32
    %c0_i32_0 = arith.constant 0 : i32
    return %arg0, %c0_i32 : i32, i32
  }
}

</mosaic_0001>

<bundles_post_ra>
// kernel: tpu_custom_call.1
= control target key start
LH: loop header
LB: loop body
LE: loop exit
PB: predicated region body
PF: predicated region fallthrough
CT: control target
= control target key end

     0   :  { %10 = vsyncpa [#allocation3], 0  ;;  %s565_s0 = inlined_call_operand.hbm [shape: f32[16,128], index: 0, kind: input, shape index: {}]   ;;  %s566_s1 = inlined_call_operand.hbm [shape: bf16[128,128], index: 1, kind: input, shape index: {}]   ;;  %s567_s2 = inlined_call_operand.vmem [shape: f32[1,128], index: 2, kind: input, shape index: {}]   ;;  %s568_s3 = inlined_call_operand.hbm [shape: bf16[128,128], index: 3, kind: input, shape index: {}]   ;;  %s569_s4 = inlined_call_operand.vmem [shape: f32[1,128], index: 4, kind: input, shape index: {}]   ;;  %s570_s5 = inlined_call_operand.hbm [shape: f32[16,128], index: 5, kind: output, shape index: {}]  }
   0x1   :  { %11 = vsyncpa [#allocation6], 0 }
   0x2   :  { %12 = vsyncpa [#allocation4], 0  ;;  %s501_s18 = smov [#allocation5]  }
   0x3   :  { %s30_s19 = sshll.u32 %s501_s18, 4  ;;  %s31_s19 = int_to_ptr.vmem [resolvable:$true] %s30_s19 }
   0x4   :  { %s423_s20 = scalar_lea.vmem %s31_s19, 1024  ;;  %p428_p1 = scmp.lt.s32.totalorder %s31_s19, %s31_s19 }
   0x5   :  { %p424_p0 = scmp.ne.s32.totalorder %s31_s19, %s423_s20  ;;  %p429_p2 = scmp.lt.s32.totalorder %s423_s20, %s423_s20 }
   0x7   :  { %p430_p3 = por %p429_p2, %p428_p1 }
   0x9   :  { %p431_p4 = pnand %p430_p3, %p424_p0 }
   0xb   :  { %434 = shalt.err (!%p431_p4)
}
   0xc   :  { %s502_s21 = smov 64   ;;  %s503_s22 = smov 4  }
   0xd   :  { %36 = dma.hbm_to_vmem [thread:$0]  %s566_s1, 1024, %s31_s19, [#allocation6], %s502_s21, %s502_s21, %s503_s22  }
   0xe   :  { %s504_s25 = smov [#allocation2]  }
   0xf   :  { %s18_s26 = sshll.u32 %s504_s25, 4  ;;  %s19_s26 = int_to_ptr.vmem [resolvable:$true] %s18_s26 }
  0x10   :  { %s443_s27 = scalar_lea.vmem %s19_s26, 256  ;;  %p448_p6 = scmp.lt.s32.totalorder %s19_s26, %s19_s26 }
  0x11   :  { %p444_p5 = scmp.ne.s32.totalorder %s19_s26, %s443_s27  ;;  %p449_p7 = scmp.lt.s32.totalorder %s443_s27, %s443_s27 }
  0x13   :  { %p450_p8 = por %p449_p7, %p448_p6 }
  0x15   :  { %p451_p9 = pnand %p450_p8, %p444_p5 }
  0x17   :  { %454 = shalt.err (!%p451_p9)
}
  0x18   :  { %s505_s28 = smov 128   ;;  %s506_s29 = smov 8  }
  0x19   :  { %24 = dma.hbm_to_vmem [thread:$0]  %s565_s0, 256, %s19_s26, [#allocation3], %s505_s28, %s505_s28, %s506_s29  }
  0x1a   :  { %s507_s1 = smov [#allocation7]  }
  0x1b   :  { %s44_s7 = sshll.u32 %s507_s1, 4  ;;  %s45_s7 = int_to_ptr.vmem [resolvable:$true] %s44_s7 }
  0x1c   :  { %s463_s8 = scalar_lea.vmem %s45_s7, 1024  ;;  %p468_p11 = scmp.lt.s32.totalorder %s45_s7, %s45_s7 }
  0x1d   :  { %p464_p10 = scmp.ne.s32.totalorder %s45_s7, %s463_s8  ;;  %p469_p12 = scmp.lt.s32.totalorder %s463_s8, %s463_s8 }
  0x1f   :  { %p470_p13 = por %p469_p12, %p468_p11 }
  0x21   :  { %p471_p0 = pnand %p470_p13, %p464_p10 }
  0x23   :  { %474 = shalt.err (!%p471_p0)
}
  0x24   :  { %50 = dma.hbm_to_vmem [thread:$0]  %s568_s3, 1024, %s45_s7, [#allocation6], %s502_s21, %s502_s21, %s503_s22  }
  0x25   :  { %495 = dma.done.wait [#allocation3], 256  }
  0x26   :  { %496 = vsyncadd [#allocation3], 4294967040 }
  0x27   :  { %497 = dma.done.wait [#allocation6], 2048  }
  0x28   :  { %498 = vsyncadd [#allocation6], 4294965248  ;;  %v508_v0 = vmov 0.0   ;;  %vm509_vm0 = vmmov 0   ;;  %v399_v1 = vld [vmem:[#allocation5 + $0x38] sm:$0xff]   ;;  %v400_v2 = vld [vmem:[#allocation5 + $0x30] sm:$0xff]  }
  0x29   :  { %349 = vmatprep.subr.bf16.mxu0 %v508_v0  ;;  %365 = vmatprep.mubr.msk.bf16.mxu0 %vm509_vm0, %v508_v0  ;;  %v401_v3 = vld [vmem:[#allocation5 + $0x28] sm:$0xff]   ;;  %v407_v4 = vld [vmem:[#allocation7 + $0x38] sm:$0xff]   ;;  %v402_v5 = vld [vmem:[#allocation5 + $0x20] sm:$0xff]   ;;  %s510_s13 = smov [#allocation8]  }
  0x2a   :  { %369 = vmatprep.subr.bf16.mxu1 %v508_v0  ;;  %385 = vmatprep.mubr.msk.bf16.mxu1 %vm509_vm0, %v508_v0  ;;  %v408_v6 = vld [vmem:[#allocation7 + $0x30] sm:$0xff]   ;;  %v403_v7 = vld [vmem:[#allocation5 + $0x18] sm:$0xff]   ;;  %v409_v8 = vld [vmem:[#allocation7 + $0x28] sm:$0xff]   ;;  %s300_s14 = sshll.u32 %s510_s13, 4  ;;  %s301_s14 = int_to_ptr.vmem [resolvable:$true] %s300_s14 }
  0x2b   :  { %350 = vmatpush3.bf16.msra.mxu0 %v399_v1  ;;  %370 = vmatpush3.bf16.msra.mxu1 %v407_v4  ;;  %v404_v9 = vld [vmem:[#allocation5 + $0x10] sm:$0xff]   ;;  %v410_v10 = vld [vmem:[#allocation7 + $0x20] sm:$0xff]   ;;  %v405_v11 = vld [vmem:[#allocation5 + $0x8] sm:$0xff]   ;;  %p480_p2 = scmp.lt.s32.totalorder %s301_s14, %s301_s14 }
  0x2c   :  { %351 = vmatprep.subr.bf16.mxu0 %v508_v0  ;;  %371 = vmatprep.subr.bf16.mxu1 %v508_v0  ;;  %v411_v12 = vld [vmem:[#allocation7 + $0x18] sm:$0xff]   ;;  %v406_v13 = vld [vmem:[#allocation5] sm:$0xff]   ;;  %v63_v14 = vld [vmem:[#allocation2] sm:$0xff] }
  0x2d   :  { %v64_v15 = vld [vmem:[#allocation2 + $0x8] sm:$0xff]  ;;  %v412_v17 = vld [vmem:[#allocation7 + $0x10] sm:$0xff]   ;;  %v413_v18 = vld [vmem:[#allocation7 + $0x8] sm:$0xff]  }
  0x2e   :  { %v65_v16 = vpack.c.bf16 %v64_v15, %v63_v14  ;;  %v414_v19 = vld [vmem:[#allocation7] sm:$0xff]   ;;  %v313_v20 = vld [vmem:[%s567_s2] ss:$0 sm:$0xff]  ;;  %s475_s2 = scalar_lea.vmem %s301_s14, 256 }
  0x2f   :  { %352 = vmatpush3.bf16.msra.mxu0 %v400_v2  ;;  %372 = vmatpush3.bf16.msra.mxu1 %v408_v6  ;;  %v322_v30 = vld [vmem:[%s569_s4] ss:$0 sm:$0xff]  ;;  %p476_p1 = scmp.ne.s32.totalorder %s301_s14, %s475_s2  ;;  %p481_p3 = scmp.lt.s32.totalorder %s475_s2, %s475_s2 }
  0x30   :  { %353 = vmatprep.subr.bf16.mxu0 %v508_v0  ;;  %373 = vmatprep.subr.bf16.mxu1 %v508_v0 }
  0x31   :  { %p482_p4 = por %p481_p3, %p480_p2 }
  0x33   :  { %354 = vmatpush3.bf16.msra.mxu0 %v401_v3  ;;  %374 = vmatpush3.bf16.msra.mxu1 %v409_v8  ;;  %p483_p5 = pnand %p482_p4, %p476_p1 }
  0x34   :  { %355 = vmatprep.subr.bf16.mxu0 %v508_v0  ;;  %375 = vmatprep.subr.bf16.mxu1 %v508_v0 }
  0x37   :  { %356 = vmatpush3.bf16.msra.mxu0 %v402_v5  ;;  %376 = vmatpush3.bf16.msra.mxu1 %v410_v10 }
  0x38   :  { %357 = vmatprep.subr.bf16.mxu0 %v508_v0  ;;  %377 = vmatprep.subr.bf16.mxu1 %v508_v0 }
  0x3b   :  { %358 = vmatpush3.bf16.msra.mxu0 %v403_v7  ;;  %378 = vmatpush3.bf16.msra.mxu1 %v411_v12 }
  0x3c   :  { %359 = vmatprep.subr.bf16.mxu0 %v508_v0  ;;  %379 = vmatprep.subr.bf16.mxu1 %v508_v0 }
  0x3f   :  { %360 = vmatpush3.bf16.msra.mxu0 %v404_v9  ;;  %380 = vmatpush3.bf16.msra.mxu1 %v412_v17 }
  0x40   :  { %361 = vmatprep.subr.bf16.mxu0 %v508_v0  ;;  %381 = vmatprep.subr.bf16.mxu1 %v508_v0 }
  0x43   :  { %362 = vmatpush3.bf16.msra.mxu0 %v405_v11  ;;  %382 = vmatpush3.bf16.msra.mxu1 %v413_v18 }
  0x44   :  { %363 = vmatprep.subr.bf16.mxu0 %v508_v0  ;;  %383 = vmatprep.subr.bf16.mxu1 %v508_v0 }
  0x47   :  { %364 = vmatpush3.bf16.msra.mxu0 %v406_v13  ;;  %384 = vmatpush3.bf16.msra.mxu1 %v414_v19 }
  0x4a   :  { %366 = vmatmul.mubr.bf16.vlgmr.msra.gmra.mxu0 %v65_v16 }
 0x10a   :  { %v171_v21 = vpop.f32.mrf.mxu0 }
 0x10b   :  { %v172_v23 = vadd.f32 %v313_v20, %v171_v21 }
 0x10c   :  { %v367_v22 = vpop.f32.mrf.mxu0 }
 0x10d   :  { %v178_v27 = vmax.f32 %v172_v23, 0.0 }
 0x10e   :  { %v174_v24 = vpop.f32.mrf.mxu0 }
 0x10f   :  { %v175_v25 = vadd.f32 %v313_v20, %v174_v24 }
 0x110   :  { %v368_v26 = vpop.f32.mrf.mxu0 }
 0x111   :  { %v179_v28 = vmax.f32 %v175_v25, 0.0 }
 0x113   :  { %v180_v29 = vpack.c.bf16 %v179_v28, %v178_v27 }
 0x115   :  { %386 = vmatmul.mubr.bf16.vlgmr.msra.gmra.mxu1 %v180_v29 }
 0x1d5   :  { %v286_v31 = vpop.f32.mrf.mxu1 }
 0x1d6   :  { %v287_v32 = vadd.f32 %v322_v30, %v286_v31 }
 0x1d7   :  { %v387_v33 = vpop.f32.mrf.mxu1 }
 0x1d8   :  { %293 = vst [vmem:[#allocation8] sm:$0xff] %v287_v32 }
 0x1d9   :  { %v289_v34 = vpop.f32.mrf.mxu1 }
 0x1da   :  { %v290_v35 = vadd.f32 %v322_v30, %v289_v34 }
 0x1db   :  { %v388_v36 = vpop.f32.mrf.mxu1 }
 0x1dc   :  { %294 = vst [vmem:[#allocation8 + $0x8] sm:$0xff] %v290_v35 }
 0x1dd   :  { %486 = shalt.err (!%p483_p5)
}
 0x1de   :  { %306 = dma.vmem_to_hbm [thread:$0]  %s301_s14, 256, %s570_s5, [#allocation4], %s505_s28, %s505_s28, %s506_s29  }
 0x1df   :  { %499 = dma.done.wait [#allocation4], 256  }
 0x1e0   :  { %500 = vsyncadd [#allocation4], 4294967040 }
 0x1e1   :  { %310 = vsyncpa [#allocation3], 1 }
 0x1e2   :  { %311 = vsyncpa [#allocation6], 1 }
 0x1e3   :  { %312 = vsyncpa [#allocation4], 1 }

</bundles_post_ra>
